<compile_context>
chip_gen: v7x
topology: tpu7x:2x2x1
jax: 0.10.0
libtpu: 0.0.40
codegen_flags: <defaults>
</compile_context>

<pallas_src>
import functools

import jax
import jax.numpy as jnp
from jax.experimental import pallas as pl
from jax.experimental.pallas import tpu as pltpu

MARGIN = 2.0
EPS = 1e-6


def _vmem_capacity_bytes():
    """Physical VMEM per core; conservative (v7x) fallback if query fails."""
    try:
        info = pltpu.get_tpu_info()
        cap = getattr(info, "vmem_capacity_bytes", None)
        if cap:
            return int(cap)
    except Exception:
        pass
    return 64 << 20  # v7x per-TC VMEM — the smallest of current generations


def _contrastive_loss_kernel(o1_ref, o2_ref, lab_ref, out_ref, *,
                             batch, tile_rows, tiles_per_shard, num_tiles,
                             margin, eps, need_mask):
    c = pl.program_id(0)   # shard (core-parallel) index
    i = pl.program_id(1)   # batch-tile index within this shard

    # Zero this shard's resident accumulator block at its first tile.
    @pl.when(i == 0)
    def _init():
        out_ref[...] = jnp.zeros_like(out_ref)

    # DMA'd in native dtype (possibly bf16); compute in f32.
    o1 = o1_ref[...].astype(jnp.float32)       # (tb, D)
    o2 = o2_ref[...].astype(jnp.float32)       # (tb, D)
    lab = lab_ref[...].astype(jnp.float32)     # (tb, 1)

    diff = o1 - o2 + eps                                   # matches F.pairwise_distance eps
    d2 = jnp.sum(diff * diff, axis=-1, keepdims=True)      # (tb, 1)
    d = jnp.sqrt(d2)                                       # EUP slot
    hinge = jnp.maximum(margin - d, 0.0)                   # clamp(margin - d, min=0)
    # Fused blend (lerp form): (1-lab)*d2 + lab*hinge^2 == d2 + lab*(hinge^2 - d2).
    # One fewer lane-sparse VALU op than the naive blend; exact for soft labels too.
    per_example = d2 + lab * (hinge * hinge - d2)          # (tb, 1)

    def _accumulate(vals):
        # Scalar partial broadcast-added over the whole resident (1, 8, 128)
        # block: one full-vreg add, no masked stores.  Wrapper reads [c, 0, 0].
        out_ref[...] += jnp.sum(vals)

    if need_mask:
        g = c * tiles_per_shard + i                        # global tile index
        full_tiles = batch // tile_rows                    # tiles with no padded rows

        @pl.when(g < full_tiles)
        def _fast():                                       # mask-free common path
            _accumulate(per_example)

        @pl.when(g >= full_tiles)
        def _ragged():                                     # ragged / out-of-range tiles
            row = jax.lax.broadcasted_iota(jnp.int32, per_example.shape, 0)
            valid = (g * tile_rows + row) < batch
            _accumulate(jnp.where(valid, per_example, 0.0))
    else:
        _accumulate(per_example)


def contrastive_loss(output1, output2, label, *, margin=MARGIN, eps=EPS,
                     max_rows_per_tile=None):
    """output1, output2: (B, D) float32/bfloat16; label: (B,)."""
    B, D = output1.shape
    assert output2.shape == (B, D)
    itemsize = jnp.dtype(output1.dtype).itemsize

    # --- generation-aware VMEM budgeting -------------------------------------
    vmem_physical = _vmem_capacity_bytes()
    # Explicit scoped-VMEM limit: leave >=16 MiB headroom below physical
    # (v7x: 48 MiB; v5e/v6e: capped at 100 MiB, well above their defaults).
    vmem_limit = int(min(100 << 20, max(32 << 20, vmem_physical - (16 << 20))))
    # Budget for the double-buffered streamed inputs: ~half the limit, <=32 MiB.
    feat_budget = min(32 << 20, vmem_limit // 2)

    # Sublane multiple by element width: 8 (f32) / 16 (bf16) / 32 (int8).
    row_mult = max(8, 32 // max(1, itemsize))

    # Bytes of buffered state per batch row:
    #   2 feature inputs x 2 buffers x D x itemsize
    # + label: 2 buffers x 128-lane-padded f32 row (budget upper bound).
    bytes_per_row = 4 * D * itemsize + 2 * 128 * 4
    tb = max(row_mult, feat_budget // bytes_per_row)
    if max_rows_per_tile is not None:
        tb = min(tb, int(max_rows_per_tile))
    tb = max(row_mult, (tb // row_mult) * row_mult)
    if tb >= B:
        tb = B  # single full-extent block (always layout-legal)

    num_tiles = pl.cdiv(B, tb)
    # v7x has 2 TensorCores: shard batch tiles across them.  On 1-TC chips the
    # "parallel" axis just iterates sequentially (no overhead, no race).
    num_shards = 2 if num_tiles >= 2 else 1
    tiles_per_shard = pl.cdiv(num_tiles, num_shards)
    need_mask = (B % tb != 0) or (num_shards * tiles_per_shard != num_tiles)

    label2d = label.reshape(B, 1)  # native dtype; cast happens in-kernel

    def _row_block_map(c, i):
        g = c * tiles_per_shard + i
        # Clamp fully out-of-range tiles onto the last real block; their rows
        # are masked to zero in-kernel.
        return (jnp.minimum(g, num_tiles - 1), 0)

    kernel = functools.partial(
        _contrastive_loss_kernel,
        batch=B, tile_rows=tb, tiles_per_shard=tiles_per_shard,
        num_tiles=num_tiles, margin=float(margin), eps=float(eps),
        need_mask=need_mask,
    )

    grid_spec = pltpu.PrefetchScalarGridSpec(
        num_scalar_prefetch=0,
        grid=(num_shards, tiles_per_shard),
        in_specs=[
            pl.BlockSpec((tb, D), _row_block_map),
            pl.BlockSpec((tb, D), _row_block_map),
            pl.BlockSpec((tb, 1), _row_block_map),
        ],
        # One resident (8, 128) f32 accumulator block per shard; block index
        # depends only on the shard id, so it stays in VMEM across the
        # "arbitrary" tile axis and never races across cores.
        out_specs=pl.BlockSpec((1, 8, 128), lambda c, i: (c, 0, 0)),
    )

    partials = pl.pallas_call(
        kernel,
        out_shape=jax.ShapeDtypeStruct((num_shards, 8, 128), jnp.float32),
        grid_spec=grid_spec,
        compiler_params=pltpu.CompilerParams(
            dimension_semantics=("parallel", "arbitrary"),
            vmem_limit_bytes=vmem_limit,
        ),
    )(output1, output2, label2d)

    # Combine the per-shard partial sums and divide by the true batch once.
    return jnp.sum(partials[:, 0, 0]) / B


def _reference(output1, output2, label, margin=MARGIN, eps=EPS):
    # Pure-JAX reference mirroring F.pairwise_distance + the PyTorch loss.
    o1 = output1.astype(jnp.float32)
    o2 = output2.astype(jnp.float32)
    lab = label.astype(jnp.float32)
    d = jnp.sqrt(jnp.sum((o1 - o2 + eps) ** 2, axis=-1))
    hinge = jnp.maximum(margin - d, 0.0)
    return jnp.mean((1.0 - lab) * d**2 + lab * hinge**2)


if __name__ == "__main__":
    key = jax.random.PRNGKey(0)
    k1, k2, k3 = jax.random.split(key, 3)

    # Small shapes; B deliberately not a multiple of the forced tile so the
    # multi-tile + 2-shard + ragged-mask + clamped-OOB-tile paths are exercised
    # (tb=8 -> 3 real tiles over a (2, 2) grid).
    B, D = 20, 32
    output1 = jax.random.normal(k1, (B, D), dtype=jnp.float32)
    output2 = jax.random.normal(k2, (B, D), dtype=jnp.float32)
    label = jax.random.bernoulli(k3, p=0.5, shape=(B,)).astype(jnp.float32)

    # f32 path, multi-tile, two shards.
    loss = contrastive_loss(output1, output2, label, max_rows_per_tile=8)
    loss = jax.block_until_ready(loss)
    ref = _reference(output1, output2, label)
    assert jnp.allclose(loss, ref, rtol=1e-5, atol=1e-5), (loss, ref)

    # bf16-input path with automatic (byte-based) tile sizing -> single full
    # block, single shard; bf16 DMA with f32 in-kernel accumulation.
    o1_bf16 = output1.astype(jnp.bfloat16)
    o2_bf16 = output2.astype(jnp.bfloat16)
    loss_bf16 = contrastive_loss(o1_bf16, o2_bf16, label)
    loss_bf16 = jax.block_until_ready(loss_bf16)
    ref_bf16 = _reference(o1_bf16, o2_bf16, label)
    assert jnp.allclose(loss_bf16, ref_bf16, rtol=1e-4, atol=1e-4), (loss_bf16, ref_bf16)

    print("KERNEL_OK")
</pallas_src>

<mosaic_0001>
module attributes {stable_mosaic.version = 11 : i64} {
  func.func @_contrastive_loss_kernel(%arg0: i32, %arg1: i32, %arg2: memref<8x32xf32, #tpu.memory_space<vmem>>, %arg3: memref<8x32xf32, #tpu.memory_space<vmem>>, %arg4: memref<8x1xf32, #tpu.memory_space<vmem>>, %arg5: memref<1x8x128xf32, #tpu.memory_space<vmem>>) attributes {dimension_semantics = [#tpu.dimension_semantics<parallel>, #tpu.dimension_semantics<arbitrary>], iteration_bounds = array<i64: 2, 2>, scalar_prefetch = 0 : i64, scratch_operands = 0 : i64, tpu.core_type = #tpu.core_type<tc>, window_params = [{transform_indices = @transform_0, window_bounds = array<i64: 8, 32>}, {transform_indices = @transform_1, window_bounds = array<i64: 8, 32>}, {transform_indices = @transform_2, window_bounds = array<i64: 8, 1>}, {transform_indices = @transform_3, window_bounds = array<i64: 1, 8, 128>}]} {
    %c0_i32 = arith.constant 0 : i32
    %0 = arith.cmpi eq, %arg1, %c0_i32 : i32
    %1 = arith.extui %0 : i1 to i32
    %c0_i32_0 = arith.constant 0 : i32
    %2 = arith.cmpi ne, %1, %c0_i32_0 : i32
    scf.if %2 {
      %cst_13 = arith.constant 0.000000e+00 : f32
      %29 = vector.broadcast %cst_13 : f32 to vector<1x8x128xf32>
      %c0_14 = arith.constant 0 : index
      %c0_15 = arith.constant 0 : index
      %c0_16 = arith.constant 0 : index
      %30 = vector.load %arg5[%c0_14, %c0_15, %c0_16] : memref<1x8x128xf32, #tpu.memory_space<vmem>>, vector<1x8x128xf32>
      tpu.vector_store %arg5[%c0_14, %c0_15, %c0_16], %29 {strides = array<i32>} : memref<1x8x128xf32, #tpu.memory_space<vmem>>, vector<1x8x128xf32>,
    } else {
    }
    %c0 = arith.constant 0 : index
    %c0_1 = arith.constant 0 : index
    %3 = vector.load %arg2[%c0, %c0_1] : memref<8x32xf32, #tpu.memory_space<vmem>>, vector<8x32xf32>
    %c0_2 = arith.constant 0 : index
    %c0_3 = arith.constant 0 : index
    %4 = vector.load %arg3[%c0_2, %c0_3] : memref<8x32xf32, #tpu.memory_space<vmem>>, vector<8x32xf32>
    %c0_4 = arith.constant 0 : index
    %c0_5 = arith.constant 0 : index
    %5 = vector.load %arg4[%c0_4, %c0_5] : memref<8x1xf32, #tpu.memory_space<vmem>>, vector<8x1xf32>
    %6 = arith.subf %3, %4 : vector<8x32xf32>
    %cst = arith.constant 9.99999997E-7 : f32
    %7 = vector.broadcast %cst : f32 to vector<8x32xf32>
    %8 = arith.addf %6, %7 : vector<8x32xf32>
    %9 = arith.mulf %8, %8 : vector<8x32xf32>
    %cst_6 = arith.constant dense<0.000000e+00> : vector<8xf32>
    %10 = vector.multi_reduction <add>, %9, %cst_6 [1] : vector<8x32xf32> to vector<8xf32>
    %11 = vector.shape_cast %10 : vector<8xf32> to vector<8x1xf32>
    %12 = math.sqrt %11 : vector<8x1xf32>
    %cst_7 = arith.constant 2.000000e+00 : f32
    %13 = vector.broadcast %cst_7 : f32 to vector<8x1xf32>
    %14 = arith.subf %13, %12 : vector<8x1xf32>
    %cst_8 = arith.constant 0.000000e+00 : f32
    %15 = vector.broadcast %cst_8 : f32 to vector<8x1xf32>
    %16 = arith.maximumf %14, %15 : vector<8x1xf32>
    %17 = arith.mulf %16, %16 : vector<8x1xf32>
    %18 = arith.subf %17, %11 : vector<8x1xf32>
    %19 = arith.mulf %5, %18 : vector<8x1xf32>
    %20 = arith.addf %11, %19 : vector<8x1xf32>
    %c2_i32 = arith.constant 2 : i32
    %21 = arith.muli %arg0, %c2_i32 : i32
    %22 = arith.addi %21, %arg1 : i32
    %c2_i32_9 = arith.constant 2 : i32
    %23 = arith.cmpi slt, %22, %c2_i32_9 : i32
    %24 = arith.extui %23 : i1 to i32
    %c0_i32_10 = arith.constant 0 : i32
    %25 = arith.cmpi ne, %24, %c0_i32_10 : i32
    scf.if %25 {
      %c0_13 = arith.constant 0 : index
      %c0_14 = arith.constant 0 : index
      %c0_15 = arith.constant 0 : index
      %29 = vector.load %arg5[%c0_13, %c0_14, %c0_15] : memref<1x8x128xf32, #tpu.memory_space<vmem>>, vector<1x8x128xf32>
      %30 = vector.shape_cast %20 : vector<8x1xf32> to vector<1x8x1xf32>
      %cst_16 = arith.constant dense<0.000000e+00> : vector<1xf32>
      %31 = vector.multi_reduction <add>, %30, %cst_16 [1, 2] : vector<1x8x1xf32> to vector<1xf32>
      %32 = vector.shape_cast %31 : vector<1xf32> to vector<1x1x1xf32>
      %33 = vector.extract %32[0, 0, 0] : f32 from vector<1x1x1xf32>
      %34 = vector.broadcast %33 : f32 to vector<1x8x128xf32>
      %35 = arith.addf %29, %34 : vector<1x8x128xf32>
      %c0_17 = arith.constant 0 : index
      %c0_18 = arith.constant 0 : index
      %c0_19 = arith.constant 0 : index
      %36 = vector.load %arg5[%c0_17, %c0_18, %c0_19] : memref<1x8x128xf32, #tpu.memory_space<vmem>>, vector<1x8x128xf32>
      tpu.vector_store %arg5[%c0_17, %c0_18, %c0_19], %35 {strides = array<i32>} : memref<1x8x128xf32, #tpu.memory_space<vmem>>, vector<1x8x128xf32>,
    } else {
    }
    %c2_i32_11 = arith.constant 2 : i32
    %26 = arith.cmpi sge, %22, %c2_i32_11 : i32
    %27 = arith.extui %26 : i1 to i32
    %c0_i32_12 = arith.constant 0 : i32
    %28 = arith.cmpi ne, %27, %c0_i32_12 : i32
    scf.if %28 {
      %29 = tpu.iota {dimensions = array<i32: 0>} : vector<8x1xi32>
      %c8_i32 = arith.constant 8 : i32
      %30 = arith.muli %22, %c8_i32 : i32
      %31 = vector.broadcast %30 : i32 to vector<8x1xi32>
      %32 = arith.addi %31, %29 : vector<8x1xi32>
      %c20_i32 = arith.constant 20 : i32
      %33 = vector.broadcast %c20_i32 : i32 to vector<8x1xi32>
      %34 = arith.cmpi slt, %32, %33 : vector<8x1xi32>
      %cst_13 = arith.constant 0.000000e+00 : f32
      %35 = vector.broadcast %cst_13 : f32 to vector<8x1xf32>
      %36 = arith.select %34, %20, %35 : vector<8x1xi1>, vector<8x1xf32>
      %c0_14 = arith.constant 0 : index
      %c0_15 = arith.constant 0 : index
      %c0_16 = arith.constant 0 : index
      %37 = vector.load %arg5[%c0_14, %c0_15, %c0_16] : memref<1x8x128xf32, #tpu.memory_space<vmem>>, vector<1x8x128xf32>
      %38 = vector.shape_cast %36 : vector<8x1xf32> to vector<1x8x1xf32>
      %cst_17 = arith.constant dense<0.000000e+00> : vector<1xf32>
      %39 = vector.multi_reduction <add>, %38, %cst_17 [1, 2] : vector<1x8x1xf32> to vector<1xf32>
      %40 = vector.shape_cast %39 : vector<1xf32> to vector<1x1x1xf32>
      %41 = vector.extract %40[0, 0, 0] : f32 from vector<1x1x1xf32>
      %42 = vector.broadcast %41 : f32 to vector<1x8x128xf32>
      %43 = arith.addf %37, %42 : vector<1x8x128xf32>
      %c0_18 = arith.constant 0 : index
      %c0_19 = arith.constant 0 : index
      %c0_20 = arith.constant 0 : index
      %44 = vector.load %arg5[%c0_18, %c0_19, %c0_20] : memref<1x8x128xf32, #tpu.memory_space<vmem>>, vector<1x8x128xf32>
      tpu.vector_store %arg5[%c0_18, %c0_19, %c0_20], %43 {strides = array<i32>} : memref<1x8x128xf32, #tpu.memory_space<vmem>>, vector<1x8x128xf32>,
    } else {
    }
    return
  }
  func.func @transform_0(%arg0: i32, %arg1: i32) -> (i32, i32) {
    %c2_i32 = arith.constant 2 : i32
    %0 = arith.muli %arg0, %c2_i32 : i32
    %1 = arith.addi %0, %arg1 : i32
    %c2_i32_0 = arith.constant 2 : i32
    %2 = arith.minsi %1, %c2_i32_0 : i32
    %c0_i32 = arith.constant 0 : i32
    %c0_i32_1 = arith.constant 0 : i32
    return %2, %c0_i32 : i32, i32
  }
  func.func @transform_1(%arg0: i32, %arg1: i32) -> (i32, i32) {
    %c2_i32 = arith.constant 2 : i32
    %0 = arith.muli %arg0, %c2_i32 : i32
    %1 = arith.addi %0, %arg1 : i32
    %c2_i32_0 = arith.constant 2 : i32
    %2 = arith.minsi %1, %c2_i32_0 : i32
    %c0_i32 = arith.constant 0 : i32
    %c0_i32_1 = arith.constant 0 : i32
    return %2, %c0_i32 : i32, i32
  }
  func.func @transform_2(%arg0: i32, %arg1: i32) -> (i32, i32) {
    %c2_i32 = arith.constant 2 : i32
    %0 = arith.muli %arg0, %c2_i32 : i32
    %1 = arith.addi %0, %arg1 : i32
    %c2_i32_0 = arith.constant 2 : i32
    %2 = arith.minsi %1, %c2_i32_0 : i32
    %c0_i32 = arith.constant 0 : i32
    %c0_i32_1 = arith.constant 0 : i32
    return %2, %c0_i32 : i32, i32
  }
  func.func @transform_3(%arg0: i32, %arg1: i32) -> (i32, i32, i32) {
    %c0_i32 = arith.constant 0 : i32
    %c0_i32_0 = arith.constant 0 : i32
    %c0_i32_1 = arith.constant 0 : i32
    return %arg0, %c0_i32, %c0_i32_0 : i32, i32, i32
  }
}

</mosaic_0001>

<bundles_post_ra>
// kernel: tpu_custom_call.1
= control target key start
LH: loop header
LB: loop body
LE: loop exit
PB: predicated region body
PF: predicated region fallthrough
CT: control target
= control target key end

     0   :  { %8 = vsyncpa [#allocation3], 0  ;;  %s1073_s0 = inlined_call_operand.vmem [shape: f32[20,32], index: 0, kind: input, shape index: {}]   ;;  %s1074_s1 = inlined_call_operand.hbm [shape: f32[20,32], index: 1, kind: input, shape index: {}]   ;;  %s1075_s2 = inlined_call_operand.vmem [shape: f32[20,1], index: 2, kind: input, shape index: {}]   ;;  %s1076_s3 = inlined_call_operand.hbm [shape: f32[2,8,128], index: 3, kind: output, shape index: {}]  }
   0x1   :  { %10 = vsyncpa [#allocation3 + $0x1], 0 }
   0x2   :  { %11 = vsyncpa [#allocation4], 0 }
   0x3   :  { %13 = vsyncpa [#allocation4 + $0x1], 0  ;;  %s819_s12 = smov 0   ;;  %s821_s13 = smov 0  }
   0x4   :  { %s823_s14 = smov 0   ;;  %s825_s15 = smov 0  }
   0x5   :  { %s827_s16 = smov 0   ;;  %s829_s17 = smov 0  }
   0x6   :  { %s831_s18 = smov 0   ;;  %s833_s19 = smov 0  }
   0x7   :  { %s835_s20 = smov 0   ;;  %s837_s21 = smov 0  }
   0x8   :  { %s839_s22 = smov 0  }
   0x9 LB: > { %s498_s23 = sadd.s32 4294967295, %s794_s22   ;;  %s499_s24 = sadd.s32 4294967294, %s794_s22   ;;  %s794_s22 = sphi %s839_s22, %s19_s22   ;;  %s790_s21 = sphi %s837_s21, %s1101_s21   ;;  %s786_s20 = sphi %s835_s20, %s1100_s20   ;;  %s782_s19 = sphi %s833_s19, %s1099_s19   ;;  %s778_s18 = sphi %s831_s18, %s1098_s18   ;;  %s774_s17 = sphi %s829_s17, %s1097_s17   ;;  %s770_s16 = sphi %s827_s16, %s1096_s16   ;;  %s766_s15 = sphi %s825_s15, %s1095_s15   ;;  %s762_s14 = sphi %s823_s14, %s1094_s14   ;;  %s758_s13 = sphi %s821_s13, %s1093_s13   ;;  %s754_s12 = sphi %s819_s12, %s1092_s12  }
   0xa   : > { %s28_s25 = sadd.s32 1, %s786_s20  ;;  %s31_s26 = sadd.s32 1, %s790_s21 }
   0xb   : > { %p29_p0 = scmp.ge.s32.totalorder %s28_s25, 2  ;;  %s502_s27 = sshll.u32 %s790_s21, 1 }
   0xc   : > { %s70_s28 = sadd.s32 %s786_s20, %s502_s27  ;;  %s80_s29 = sadd.s32 1, %s774_s17 }
   0xd   : > { %s1103_s25 = smov (%p29_p0, %s28_s25), 0  ;;  %s1105_s26 = smov (!%p29_p0, %s31_s26), %s790_s21 }
   0xe   : > { %p71_p1 = scmp.lt.s32.totalorder %s70_s28, 2  ;;  %p87_p2 = scmp.ne.s32.totalorder %s774_s17, %s770_s16 }
   0xf   : > { %p33_p3 = scmp.ge.s32.totalorder %s1105_s26, 2  ;;  %p88_p4 = scmp.eq.s32.totalorder %s794_s22, 0 }
  0x10   : > { %s1107_s28 = smov (!%p71_p1, %s70_s28), 2  ;;  %p93_p6 = scmp.ne.s32.totalorder %s770_s16, %s766_s15 }
  0x11   : > { %s1109_s26 = smov (%p33_p3, %s1105_s26), 0  ;;  %p889_p5 = por %p88_p4, %p87_p2 }
  0x12   : > { %1080 = sst [smem:[#allocation8_spill]] %s1109_s26  ;;  %s503_s4 = sshll.u32 %s1109_s26, 1 }
  0x13   : > { %p94_p7 = scmp.eq.s32.totalorder %s498_s23, 0  ;;  %s74_s5 = sadd.s32 %s503_s4, %s1103_s25 }
  0x14   : > { %s137_s6 = ssub.s32 %s790_s21, %s1109_s26  ;;  %p75_p8 = scmp.lt.s32.totalorder %s74_s5, 2 }
  0x15   : > { %p901_p9 = por %p94_p7, %p93_p6  ;;  %p138_p10 = scmp.eq.s32.totalorder %s137_s6, 0 }
  0x16   : > { %s140_s8 = sadd.s32 1, %s762_s14  ;;  %s1111_s5 = smov (!%p75_p8, %s74_s5), 2 }
  0x17   : > { %s907_s9 = scalar_select %p138_p10, %s762_s14, %s140_s8  }
  0x18   : > { %s77_s10 = ssub.s32 %s1107_s28, %s1111_s5  ;;  %p150_p11 = scmp.ne.s32.totalorder %s762_s14, %s758_s13 }
  0x19   : > { %p78_p12 = scmp.eq.s32.totalorder %s77_s10, 0  ;;  %p151_p13 = scmp.eq.s32.totalorder %s498_s23, 3 }
  0x1a   : > { %p156_p0 = scmp.ne.s32.totalorder %s758_s13, %s754_s12  ;;  %p157_p1 = scmp.eq.s32.totalorder %s499_s24, 3 }
  0x1b   : > { %s918_s11 = scalar_select %p78_p12, %s774_s17, %s80_s29  }
  0x1c   : > { %p920_p2 = por %p151_p13, %p150_p11  ;;  %p924_p3 = por %p157_p1, %p156_p0 }
  0x1d   : > { %p549_p4 = scmp.lt.s32.totalorder %s794_s22, 4  ;;  %s192_s4 = sand.u32 1, %s774_s17  }
  0x1e   : > { %s1083_s15 = scalar_select %p920_p2, 1, 0 }
  0x1f   : > { %s1084_s27 = scalar_select %p924_p3, 1, 0 }
  0x20   : > { %s510_s5 = sshll.u32 %s1107_s28, 7  ;;  %s508_s6 = sshll.u32 %s192_s4, 3 }
  0x21   : > { %s933_s10 = scalar_lea.hbm %s1074_s1, %s510_s5  ;;  %s196_s24 = scalar_lea.vmem [#allocation2], %s508_s6 }
  0x22   : > { %s207_s29 = sshll.u32 %s196_s24, 4  ;;  %p937_p6 = pnand %p549_p4, %p889_p5  ;;  %s941_s29 = int_to_ptr.vmem [resolvable:$true] %s207_s29 }
  0x23   : > { %s193_s28 = scalar_lea.sflag [#allocation3], %s192_s4  ;;  %s642_s5 = scalar_lea.hbm %s933_s10, 128 }
  0x24   : > { %p643_p10 = scmp.ne.s32.totalorder %s933_s10, %s642_s5  ;;  %p644_p11 = pneg %p937_p6 }
  0x25   : > { %s647_s8 = scalar_lea.hbm %s1074_s1, 384  ;;  %p648_p5 = scmp.lt.u32.totalorder %s933_s10, %s1074_s1 }
  0x26   : > { %p645_p12 = pnand %p644_p11, %p643_p10  ;;  %p649_p0 = scmp.lt.u32.totalorder %s647_s8, %s642_s5 }
  0x27   : > { %p651_p4 = scmp.lt.u32.totalorder %s642_s5, %s933_s10 }
  0x28   : > { %p646_p13 = pneg %p645_p12  ;;  %p650_p1 = por %p649_p0, %p648_p5 }
  0x2a   : > { %p652_p7 = por %p651_p4, %p650_p1 }
  0x2c   : > { %p653_p8 = pnand %p652_p7, %p646_p13 }
  0x2e   : > { %656 = shalt.err (!%p653_p8)
}
  0x2f   : > { %s657_s4 = scalar_lea.vmem %s941_s29, 128  ;;  %s796_s30 = smov [#allocation2]  }
  0x30   : > { %p658_p10 = scmp.ne.s32.totalorder %s941_s29, %s657_s4  ;;  %s662_s6 = sshll.u32 %s796_s30, 4  ;;  %s663_s6 = int_to_ptr.vmem [resolvable:$false] %s662_s6 }
  0x31   : > { %s664_s23 = scalar_lea.vmem %s663_s6, 256  ;;  %p665_p2 = scmp.lt.s32.totalorder %s941_s29, %s663_s6 }
  0x32   : > { %p660_p12 = pnand %p658_p10, %p644_p11  ;;  %p666_p5 = scmp.lt.s32.totalorder %s664_s23, %s657_s4 }
  0x34   : > { %p661_p3 = pneg %p660_p12  ;;  %p667_p0 = por %p666_p5, %p665_p2 }
  0x36   : > { %p668_p1 = pnand %p667_p0, %p661_p3 }
  0x38   : > { %671 = shalt.err (!%p668_p1)
}
  0x39   : > { %544 = dma.hbm_to_vmem [thread:$0]  (!%p937_p6), %s933_s10, 128, %s941_s29, %s193_s28  }
  0x3a   : > { %p1086_p7 = scmp.lt.s32.totalorder %s794_s22, 5  ;;  %p1087_p8 = scmp.ge.s32.totalorder %s794_s22, 1 }
  0x3c   : > { %p228_p11 = pnand %p1087_p8, %p1086_p7 }
  0x3d   : > { %s233_s5 = sand.u32 (!%p228_p11), 1, %s770_s16  }
  0x3e   : > { %231 = sbr.rel (%p228_p11) target bundleno = 712 (0x2c8), region = 32  ;;  %s512_s8 = sshll.u32 (!%p228_p11), %s233_s5, 3 }
  0x3f   : > { %s234_s24 = scalar_lea.sflag (!%p228_p11), [#allocation3], %s233_s5  ;;  %s237_s4 = scalar_lea.vmem (!%p228_p11), [#allocation2], %s512_s8 }
  0x45   : > { %745 = dma.done.wait (%p901_p9), %s234_s24, 128  }
  0x46   : > { %747 = vsyncadd (%p901_p9), %s234_s24, 4294967168  ;;  %s1079_s26 = sand.u32 1, %s758_s13   ;;  %s514_s10 = sshll.u32 %s782_s19, 1 }
  0x47   : > { %s513_s29 = sshll.u32 %s1079_s26, 3  ;;  %s984_s28 = sadd.s32 %s778_s18, %s514_s10 }
  0x48   : > { %p278_p2 = scmp.lt.s32.totalorder %s984_s28, 2  ;;  %s998_s10 = scalar_lea.vmem [#allocation5], %s513_s29 }
  0x49   : > { %p524_p9 = scmp.ne.s32.totalorder %s778_s18, 0 }
  0x4a   : > { %s279_s30 = scalar_select %p278_p2, %s984_s28, 2 }
  0x4b   : > { %307 = sbr.rel (%p524_p9) target bundleno = 82 (0x52), region = 40  ;;  %v797_v0 = vmov (!%p524_p9), 0.0  }
  0x4c   : > { %s1113_s30 = smov (!%p278_p2, %s279_s30), 2  ;;  %308 = vst [vmem:[%s998_s10] sm:$0xff] (!%p524_p9), %v797_v0 }
  0x4d   : > { %s518_s7 = sshll.u32 %s1113_s30, 3 }
  0x4e   : > { %s283_s5 = scalar_lea.vmem %s1073_s0, %s518_s7  ;;  %s299_s26 = scalar_lea.vmem %s1075_s2, %s518_s7 }
  0x52 PF: > { %v309_v1 = vld [vmem:[%s283_s5] sm:$0xff]  ;;  %vm315_vm0 = vcmask 261120   ;;  %p526_p3 = scmp.ge.s32.totalorder %s984_s28, 2 }
  0x53   : > { %v310_v2 = vld [vmem:[%s237_s4] sm:$0xff]  ;;  %vm339_vm3 = vcmask (!%p526_p3), 7168   ;;  %v338_v28 = vld [vmem:[%s998_s10] sm:$0xff] (!%p526_p3) }
  0x54   : > { %v312_v3 = vsub.f32 %v309_v1, %v310_v2  ;;  %v311_v16 = vld [vmem:[%s299_s26] sm:$0xff] }
  0x56   : > { %v313_v4 = vadd.f32 1e-06, %v312_v3 }
  0x58   : > { %v314_v5 = vmul.f32 %v313_v4, %v313_v4 }
  0x5a   : > { %v316_v6 = vsel %vm315_vm0, %v314_v5, 0.0 }
  0x5b   : > { %317 = vadd.xlane.f32.xlu0 %v316_v6 }
  0xe8   : > { %v318_v7 = vpop.xlane.xlu0 %317 }
  0xe9   : > { %640 = vrsqrt.f32 %v318_v7  ;;  %vm321_vm1 = vcmp.eq.f32.partialorder %v318_v7, inf  ;;  %v324_v10 = vand.u32 2147483648, %v318_v7  ;;  %vm323_vm2 = vcmp.eq.f32.partialorder %v318_v7, 0.0 }
  0xf3   : > { %v641_v8 = vpop.eup %640 }
  0xf4   : > { %v320_v9 = vmul.f32 %v641_v8, %v318_v7 }
  0xf6   : > { %v322_v11 = vsel %vm321_vm1, %v318_v7, %v320_v9 }
  0xf7   : > { %v325_v12 = vsel %vm323_vm2, %v324_v10, %v322_v11 }
  0xf8   : > { %v326_v13 = vsub.f32 2.0, %v325_v12 }
  0xfa   : > { %v327_v14 = vmax.f32 %v326_v13, 0.0 }
  0xfc   : > { %v328_v15 = vmul.f32 %v327_v14, %v327_v14  ;;  %337 = sbr.rel (%p526_p3) target bundleno = 469 (0x1d5), region = 44 }
  0xfe   : > { %v329_v17 = vsub.f32 %v328_v15, %v318_v7 }
 0x100   : > { %v330_v18 = vmul.f32 %v329_v17, %v311_v16 }
 0x102   : > { %v331_v19 = vadd.f32 %v330_v18, %v318_v7 }
 0x104   : > { %v340_v20 = vsel %vm339_vm3, %v331_v19, 0.0 }
 0x105   : > { %341 = vadd.xlane.f32.xlu0 %v340_v20 }
 0x192   : > { %v342_v21 = vpop.xlane.xlu0 %341 }
 0x193   : > { %v343_v22 = vrot.slane %v342_v21, 4 }
 0x195   : > { %v344_v23 = vadd.f32 %v343_v22, %v342_v21 }
 0x197   : > { %v345_v24 = vrot.slane %v344_v23, 2 }
 0x199   : > { %v346_v25 = vadd.f32 %v345_v24, %v344_v23 }
 0x19b   : > { %v347_v26 = vrot.slane %v346_v25, 1 }
 0x19d   : > { %v348_v27 = vadd.f32 %v347_v26, %v346_v25 }
 0x19f   : > { %533 = vpush %v348_v27 }
 0x1d0   : > { %s534_s18 = spop %533 }
 0x1d1   : > { %v350_v29 = vstv %s534_s18 }
 0x1d2   : > { %v351_v30 = vadd.f32 %v350_v29, %v338_v28 }
 0x1d4   : > { %352 = vst [vmem:[%s998_s10] sm:$0xff] %v351_v30 }
 0x1d5 PF: > { %356 = sbr.rel (%p278_p2) target bundleno = 686 (0x2ae), region = 48  ;;  %v357_v31 = vlaneseq (!%p278_p2)  ;;  %s528_s4 = sshll.u32 (!%p278_p2), %s984_s28, 3  ;;  %vm365_vm4 = vcmask (!%p278_p2), 7168  }
 0x1d6   : > { %v360_v32 = vstv (!%p278_p2), %s528_s4 }
 0x1d7   : > { %v358_v33 = vshrl.u32 (!%p278_p2), %v357_v31, 7 }
 0x1d9   : > { %v361_v34 = vadd.s32 (!%p278_p2), %v360_v32, %v358_v33 }
 0x1db   : > { %vm362_vm5 = vcmp.lt.s32.totalorder (!%p278_p2), %v361_v34, 20  ;;  %v364_v44 = vld [vmem:[%s998_s10] sm:$0xff] (!%p278_p2) }
 0x1dc   : > { %v363_v35 = vsel %vm362_vm5, %v331_v19, 0.0 }
 0x1dd   : > { %v366_v36 = vsel %vm365_vm4, %v363_v35, 0.0 }
 0x1de   : > { %367 = vadd.xlane.f32.xlu0 %v366_v36 }
 0x26b   : > { %v368_v37 = vpop.xlane.xlu0 %367 }
 0x26c   : > { %v369_v38 = vrot.slane %v368_v37, 4 }
 0x26e   : > { %v370_v39 = vadd.f32 %v369_v38, %v368_v37 }
 0x270   : > { %v371_v40 = vrot.slane %v370_v39, 2 }
 0x272   : > { %v372_v41 = vadd.f32 %v371_v40, %v370_v39 }
 0x274   : > { %v373_v42 = vrot.slane %v372_v41, 1 }
 0x276   : > { %v374_v43 = vadd.f32 %v373_v42, %v372_v41 }
 0x278   : > { %535 = vpush %v374_v43 }
 0x2a9   : > { %s536_s26 = spop %535 }
 0x2aa   : > { %v376_v45 = vstv %s536_s26 }
 0x2ab   : > { %v377_v46 = vadd.f32 %v376_v45, %v364_v44 }
 0x2ad   : > { %378 = vst [vmem:[%s998_s10] sm:$0xff] %v377_v46 }
 0x2ae PF: > { %s530_s29 = sshll.u32 %s782_s19, 7  ;;  %s393_s6 = sshll.u32 %s998_s10, 4  ;;  %s394_s6 = int_to_ptr.vmem [resolvable:$true] %s393_s6 }
 0x2af   : > { %s1014_s7 = scalar_lea.hbm %s1076_s3, %s530_s29  ;;  %s1088_s23 = sand.u32 1, %s758_s13  }
 0x2b0   : > { %s380_s5 = scalar_lea.sflag [#allocation4], %s1088_s23  ;;  %s672_s8 = scalar_lea.vmem %s394_s6, 128 }
 0x2b1   : > { %p673_p6 = scmp.ne.s32.totalorder %s394_s6, %s672_s8  ;;  %p1089_p13 = scmp.ne.s32.totalorder %s1083_s15, 0 }
 0x2b2   : > { %s798_s24 = smov [#allocation5]  }
 0x2b3   : > { %p674_p4 = pnand %p673_p6, %p1089_p13  ;;  %s676_s18 = sshll.u32 %s798_s24, 4  ;;  %s677_s18 = int_to_ptr.vmem [resolvable:$false] %s676_s18 }
 0x2b4   : > { %s678_s4 = scalar_lea.vmem %s677_s18, 256  ;;  %p679_p12 = scmp.lt.s32.totalorder %s394_s6, %s677_s18 }
 0x2b5   : > { %p675_p10 = pneg %p674_p4  ;;  %p680_p5 = scmp.lt.s32.totalorder %s678_s4, %s672_s8 }
 0x2b7   : > { %p681_p0 = por %p680_p5, %p679_p12 }
 0x2b9   : > { %p682_p1 = pnand %p681_p0, %p675_p10 }
 0x2bb   : > { %685 = shalt.err (!%p682_p1)
}
 0x2bc   : > { %s686_s19 = scalar_lea.hbm %s1014_s7, 128  ;;  %s690_s29 = scalar_lea.hbm %s1076_s3, 256 }
 0x2bd   : > { %p687_p7 = scmp.ne.s32.totalorder %s1014_s7, %s686_s19  ;;  %p691_p2 = scmp.lt.u32.totalorder %s1014_s7, %s1076_s3 }
 0x2be   : > { %p692_p9 = scmp.lt.u32.totalorder %s690_s29, %s686_s19  ;;  %p694_p6 = scmp.lt.u32.totalorder %s686_s19, %s1014_s7 }
 0x2bf   : > { %p688_p8 = pnand %p687_p7, %p1089_p13 }
 0x2c0   : > { %p693_p3 = por %p692_p9, %p691_p2 }
 0x2c1   : > { %p689_p11 = pneg %p688_p8 }
 0x2c2   : > { %p695_p4 = por %p694_p6, %p693_p3 }
 0x2c4   : > { %p696_p10 = pnand %p695_p4, %p689_p11 }
 0x2c6   : > { %699 = shalt.err (!%p696_p10)
}
 0x2c7   : > { %539 = dma.vmem_to_hbm [thread:$0]  (%p1089_p13), %s394_s6, 128, %s1014_s7, %s380_s5  }
 0x2c8 PF: > { %p550_p12 = scmp.ge.s32.totalorder %s794_s22, 2  ;;  %s405_s23 = sand.u32 1, %s754_s12  }
 0x2c9   : > { %p1090_p5 = scmp.ne.s32.totalorder %s1084_s27, 0  ;;  %s406_s8 = scalar_lea.sflag [#allocation4], %s405_s23 }
 0x2cb   : > { %p546_p0 = pnand %p550_p12, %p1090_p5 }
 0x2cd   : > { %749 = dma.done.wait (!%p546_p0), %s406_s8, 128  }
 0x2ce   : > { %751 = vsyncadd (!%p546_p0), %s406_s8, 4294967168  ;;  %s19_s22 = sadd.s32 1, %s794_s22   ;;  %s1091_s7 = sld [smem:[#allocation8_spill]] }
 0x2cf   : > { %p16_p1 = scmp.ge.s32.totalorder %s19_s22, 6   ;;  %s1092_s12 = smov %s758_s13 }
 0x2d0   : > { %s1093_s13 = smov %s762_s14  ;;  %s1094_s14 = smov %s907_s9 }
 0x2d1   : > { %s1095_s15 = smov %s770_s16  ;;  %s1096_s16 = smov %s774_s17 }
 0x2d2   : > { %s1097_s17 = smov %s918_s11  ;;  %s1098_s18 = smov %s786_s20 }
 0x2d3   : > { %s1099_s19 = smov %s790_s21  ;;  %s1100_s20 = smov %s1103_s25 }
 0x2d4   : > { %s1101_s21 = smov %s1091_s7  ;;  %18 = sbr.rel (!%p16_p1) target bundleno = 9 (0x9), region = 95 }
 0x2db   :  { %411 = vsyncpa [#allocation3], 1 }
 0x2dc   :  { %413 = vsyncpa [#allocation3 + $0x1], 1 }
 0x2dd   :  { %414 = vsyncpa [#allocation4], 1 }
 0x2de   :  { %416 = vsyncpa [#allocation4 + $0x1], 1 }

</bundles_post_ra>
